<compile_context>
chip_gen: v6e
topology: v6e:2x2x1
jax: 0.10.0
libtpu: 0.0.40
codegen_flags: <defaults>
</compile_context>

<pallas_src>
import math
import numpy as np
import jax
import jax.numpy as jnp
from jax.experimental import pallas as pl
from jax.experimental.pallas import tpu as pltpu


# ---------------------------------------------------------------------------
# Host-side deterministic parameter construction (mirrors sinc_conv.__init__ +
# the per-filter construction inside sinc_conv.forward; fully data-independent).
# ---------------------------------------------------------------------------

def build_sinc_filters(n_filt, filt_dim, fs):
    low_freq_mel = 80.0
    high_freq_mel = 2595.0 * np.log10(1.0 + fs / 2.0 / 700.0)
    mel_points = np.linspace(low_freq_mel, high_freq_mel, n_filt)
    f_cos = 700.0 * (10.0 ** (mel_points / 2595.0) - 1.0)
    b1 = np.roll(f_cos, 1)
    b2 = np.roll(f_cos, -1)
    b1[0] = 30.0
    b2[-1] = fs / 2.0 - 100.0
    freq_scale = fs * 1.0
    filt_b1 = b1 / freq_scale            # nn.Parameter (deterministic init)
    filt_band = (b2 - b1) / freq_scale   # nn.Parameter (deterministic init)

    N = filt_dim
    t_right = (np.linspace(1, (N - 1) / 2, int((N - 1) / 2)) / fs).astype(np.float32)
    min_freq, min_band = 50.0, 50.0
    filt_beg = (np.abs(filt_b1) + min_freq / freq_scale).astype(np.float32)
    filt_end = (filt_beg + (np.abs(filt_band) + min_band / freq_scale)).astype(np.float32)
    n = np.linspace(0, N, N)
    window = (0.54 - 0.46 * np.cos(2 * math.pi * n / N)).astype(np.float32)

    def _sinc(band, t):
        y_right = np.sin(2 * math.pi * band * t) / (2 * math.pi * band * t)
        return np.concatenate([y_right[::-1], np.ones(1, np.float32), y_right])

    filters = np.zeros((n_filt, filt_dim), np.float32)
    for i in range(n_filt):
        lp1 = 2 * filt_beg[i] * _sinc(filt_beg[i] * freq_scale, t_right)
        lp2 = 2 * filt_end[i] * _sinc(filt_end[i] * freq_scale, t_right)
        bp = lp2 - lp1
        bp = bp / np.max(bp)
        filters[i, :] = bp * window
    return filters.astype(np.float32)    # (N_filt, Filt_dim)


def build_interp_matrix(l_in, l_out):
    """F.interpolate(mode='linear', align_corners=False) as a (l_in, l_out) matrix."""
    m = np.zeros((l_in, l_out), np.float32)
    scale = l_in / l_out
    for j in range(l_out):
        src = (j + 0.5) * scale - 0.5
        if src < 0.0:
            src = 0.0
        i0 = min(int(np.floor(src)), l_in - 1)
        i1 = min(i0 + 1, l_in - 1)
        w = src - i0
        m[i0, j] += 1.0 - w
        m[i1, j] += w
    return m


# ---------------------------------------------------------------------------
# Pallas kernel: one batch element per grid step; all activations stay in VMEM.
# ---------------------------------------------------------------------------

def _make_kernel(filt_dim, l_conv):
    def kernel(x_ref, filt_ref, interp_ref, o_ref):
        x = x_ref[0]                                        # (d_model, seq_len)

        # F.conv1d with the same K-tap filter repeated over all d_model input channels
        # == channel-sum, then a single-channel K-tap correlation.
        xs = jnp.sum(x, axis=0, keepdims=True)              # (1, seq_len)   XLU reduce

        filt = filt_ref[...]                                # (N_filt, K)
        conv = filt[:, 0:1] * xs[:, 0:l_conv]               # (N_filt, L_conv) VPU MAC
        for k in range(1, filt_dim):
            conv = conv + filt[:, k:k + 1] * xs[:, k:k + l_conv]

        # Linear interpolation back to seq_len, folded into one MXU matmul.
        y = jnp.dot(conv, interp_ref[...],
                    preferred_element_type=jnp.float32)     # (N_filt, seq_len)
        o_ref[0] = y.astype(o_ref.dtype)

    return kernel


def sinc_conv_forward(x, filters, interp):
    b, d_model, seq_len = x.shape
    n_filt, filt_dim = filters.shape
    l_conv = seq_len - filt_dim + 1
    assert interp.shape == (l_conv, seq_len)

    kernel = _make_kernel(filt_dim, l_conv)
    return pl.pallas_call(
        kernel,
        out_shape=jax.ShapeDtypeStruct((b, n_filt, seq_len), jnp.float32),
        grid=(b,),
        in_specs=[
            pl.BlockSpec((1, d_model, seq_len), lambda i: (i, 0, 0)),
            pl.BlockSpec((n_filt, filt_dim), lambda i: (0, 0)),
            pl.BlockSpec((l_conv, seq_len), lambda i: (0, 0)),
        ],
        out_specs=pl.BlockSpec((1, n_filt, seq_len), lambda i: (i, 0, 0)),
        compiler_params=pltpu.CompilerParams(dimension_semantics=("parallel",)),
    )(x, filters, interp)


# ---------------------------------------------------------------------------
# Demo / self-check
# ---------------------------------------------------------------------------

if __name__ == "__main__":
    # Shapes consistent with the parent net: sinc_conv(d_model, 7, fs=3), x in NCL.
    B, d_model, seq_len = 2, 32, 16
    N_filt, Filt_dim, fs = d_model, 7, 3

    key = jax.random.PRNGKey(0)
    x = jax.random.normal(key, (B, d_model, seq_len), jnp.float32)

    filters = jnp.asarray(build_sinc_filters(N_filt, Filt_dim, fs))           # (32, 7)
    interp = jnp.asarray(build_interp_matrix(seq_len - Filt_dim + 1, seq_len))  # (10, 16)

    out = jax.block_until_ready(sinc_conv_forward(x, filters, interp))
    assert out.shape == (B, N_filt, seq_len)
    assert bool(jnp.all(jnp.isfinite(out)))

    # Pure-JAX reference (no Pallas) for a sanity check of the kernel lowering.
    l_conv = seq_len - Filt_dim + 1
    xs = jnp.sum(x, axis=1)                                                   # (B, L)
    W = jnp.stack([xs[:, k:k + l_conv] for k in range(Filt_dim)], axis=1)     # (B, K, Lc)
    ref = jnp.einsum('fk,bkl->bfl', filters, W)                               # conv1d
    ref = jnp.einsum('bfl,lj->bfj', ref, interp)                              # interpolate
    assert bool(jnp.allclose(out, ref, rtol=2e-2, atol=2e-2)), "kernel mismatch vs reference"

    print("KERNEL_OK")
</pallas_src>

<mosaic_0001>
module attributes {stable_mosaic.version = 11 : i64} {
  func.func @kernel(%arg0: i32, %arg1: memref<1x32x16xf32, #tpu.memory_space<vmem>>, %arg2: memref<32x7xf32, #tpu.memory_space<vmem>>, %arg3: memref<10x16xf32, #tpu.memory_space<vmem>>, %arg4: memref<1x32x16xf32, #tpu.memory_space<vmem>>) attributes {dimension_semantics = [#tpu.dimension_semantics<parallel>], iteration_bounds = array<i64: 2>, scalar_prefetch = 0 : i64, scratch_operands = 0 : i64, tpu.core_type = #tpu.core_type<tc>, window_params = [{transform_indices = @transform_0, window_bounds = array<i64: 1, 32, 16>}, {pipeline_mode = #tpu.pipeline_mode<synchronous>, transform_indices = @transform_1, window_bounds = array<i64: 32, 7>}, {pipeline_mode = #tpu.pipeline_mode<synchronous>, transform_indices = @transform_2, window_bounds = array<i64: 10, 16>}, {transform_indices = @transform_3, window_bounds = array<i64: 1, 32, 16>}]} {
    %c0 = arith.constant 0 : index
    %c0_0 = arith.constant 0 : index
    %c0_1 = arith.constant 0 : index
    %0 = vector.load %arg1[%c0, %c0_0, %c0_1] : memref<1x32x16xf32, #tpu.memory_space<vmem>>, vector<1x32x16xf32>
    %1 = vector.shape_cast %0 : vector<1x32x16xf32> to vector<32x16xf32>
    %cst = arith.constant dense<0.000000e+00> : vector<16xf32>
    %2 = vector.multi_reduction <add>, %1, %cst [0] : vector<32x16xf32> to vector<16xf32>
    %3 = vector.shape_cast %2 : vector<16xf32> to vector<1x16xf32>
    %c0_2 = arith.constant 0 : index
    %c0_3 = arith.constant 0 : index
    %4 = vector.load %arg2[%c0_2, %c0_3] : memref<32x7xf32, #tpu.memory_space<vmem>>, vector<32x7xf32>
    %5 = vector.extract_strided_slice %4 {offsets = [0, 0], sizes = [32, 1], strides = [1, 1]} : vector<32x7xf32> to vector<32x1xf32>
    %6 = vector.extract_strided_slice %3 {offsets = [0, 0], sizes = [1, 10], strides = [1, 1]} : vector<1x16xf32> to vector<1x10xf32>
    %7 = vector.broadcast %5 : vector<32x1xf32> to vector<32x10xf32>
    %8 = vector.broadcast %6 : vector<1x10xf32> to vector<32x10xf32>
    %9 = arith.mulf %7, %8 : vector<32x10xf32>
    %10 = vector.extract_strided_slice %4 {offsets = [0, 1], sizes = [32, 1], strides = [1, 1]} : vector<32x7xf32> to vector<32x1xf32>
    %11 = vector.extract_strided_slice %3 {offsets = [0, 1], sizes = [1, 10], strides = [1, 1]} : vector<1x16xf32> to vector<1x10xf32>
    %12 = vector.broadcast %10 : vector<32x1xf32> to vector<32x10xf32>
    %13 = vector.broadcast %11 : vector<1x10xf32> to vector<32x10xf32>
    %14 = arith.mulf %12, %13 : vector<32x10xf32>
    %15 = arith.addf %9, %14 : vector<32x10xf32>
    %16 = vector.extract_strided_slice %4 {offsets = [0, 2], sizes = [32, 1], strides = [1, 1]} : vector<32x7xf32> to vector<32x1xf32>
    %17 = vector.extract_strided_slice %3 {offsets = [0, 2], sizes = [1, 10], strides = [1, 1]} : vector<1x16xf32> to vector<1x10xf32>
    %18 = vector.broadcast %16 : vector<32x1xf32> to vector<32x10xf32>
    %19 = vector.broadcast %17 : vector<1x10xf32> to vector<32x10xf32>
    %20 = arith.mulf %18, %19 : vector<32x10xf32>
    %21 = arith.addf %15, %20 : vector<32x10xf32>
    %22 = vector.extract_strided_slice %4 {offsets = [0, 3], sizes = [32, 1], strides = [1, 1]} : vector<32x7xf32> to vector<32x1xf32>
    %23 = vector.extract_strided_slice %3 {offsets = [0, 3], sizes = [1, 10], strides = [1, 1]} : vector<1x16xf32> to vector<1x10xf32>
    %24 = vector.broadcast %22 : vector<32x1xf32> to vector<32x10xf32>
    %25 = vector.broadcast %23 : vector<1x10xf32> to vector<32x10xf32>
    %26 = arith.mulf %24, %25 : vector<32x10xf32>
    %27 = arith.addf %21, %26 : vector<32x10xf32>
    %28 = vector.extract_strided_slice %4 {offsets = [0, 4], sizes = [32, 1], strides = [1, 1]} : vector<32x7xf32> to vector<32x1xf32>
    %29 = vector.extract_strided_slice %3 {offsets = [0, 4], sizes = [1, 10], strides = [1, 1]} : vector<1x16xf32> to vector<1x10xf32>
    %30 = vector.broadcast %28 : vector<32x1xf32> to vector<32x10xf32>
    %31 = vector.broadcast %29 : vector<1x10xf32> to vector<32x10xf32>
    %32 = arith.mulf %30, %31 : vector<32x10xf32>
    %33 = arith.addf %27, %32 : vector<32x10xf32>
    %34 = vector.extract_strided_slice %4 {offsets = [0, 5], sizes = [32, 1], strides = [1, 1]} : vector<32x7xf32> to vector<32x1xf32>
    %35 = vector.extract_strided_slice %3 {offsets = [0, 5], sizes = [1, 10], strides = [1, 1]} : vector<1x16xf32> to vector<1x10xf32>
    %36 = vector.broadcast %34 : vector<32x1xf32> to vector<32x10xf32>
    %37 = vector.broadcast %35 : vector<1x10xf32> to vector<32x10xf32>
    %38 = arith.mulf %36, %37 : vector<32x10xf32>
    %39 = arith.addf %33, %38 : vector<32x10xf32>
    %40 = vector.extract_strided_slice %4 {offsets = [0, 6], sizes = [32, 1], strides = [1, 1]} : vector<32x7xf32> to vector<32x1xf32>
    %41 = vector.extract_strided_slice %3 {offsets = [0, 6], sizes = [1, 10], strides = [1, 1]} : vector<1x16xf32> to vector<1x10xf32>
    %42 = vector.broadcast %40 : vector<32x1xf32> to vector<32x10xf32>
    %43 = vector.broadcast %41 : vector<1x10xf32> to vector<32x10xf32>
    %44 = arith.mulf %42, %43 : vector<32x10xf32>
    %45 = arith.addf %39, %44 : vector<32x10xf32>
    %c0_4 = arith.constant 0 : index
    %c0_5 = arith.constant 0 : index
    %46 = vector.load %arg3[%c0_4, %c0_5] : memref<10x16xf32, #tpu.memory_space<vmem>>, vector<10x16xf32>
    %cst_6 = arith.constant dense<0.000000e+00> : vector<32x16xf32>
    %47 = tpu.matmul %45, %46, %cst_6 {dimension_numbers = #tpu.dot_dimension_numbers<[1], [0], [0], [1], [0, 0, 1, 1], [], []>} : vector<32x10xf32>, vector<10x16xf32>, vector<32x16xf32> -> vector<32x16xf32>
    %c0_7 = arith.constant 0 : index
    %c0_8 = arith.constant 0 : index
    %c0_9 = arith.constant 0 : index
    %48 = vector.load %arg4[%c0_7, %c0_8, %c0_9] : memref<1x32x16xf32, #tpu.memory_space<vmem>>, vector<1x32x16xf32>
    %49 = vector.shape_cast %48 : vector<1x32x16xf32> to vector<32x16xf32>
    %50 = vector.shape_cast %47 : vector<32x16xf32> to vector<1x32x16xf32>
    tpu.vector_store %arg4[%c0_7, %c0_8, %c0_9], %50 {strides = array<i32>} : memref<1x32x16xf32, #tpu.memory_space<vmem>>, vector<1x32x16xf32>,
    return
  }
  func.func @transform_0(%arg0: i32) -> (i32, i32, i32) {
    %c0_i32 = arith.constant 0 : i32
    %c0_i32_0 = arith.constant 0 : i32
    %c0_i32_1 = arith.constant 0 : i32
    return %arg0, %c0_i32, %c0_i32_0 : i32, i32, i32
  }
  func.func @transform_1(%arg0: i32) -> (i32, i32) {
    %c0_i32 = arith.constant 0 : i32
    %c0_i32_0 = arith.constant 0 : i32
    %c0_i32_1 = arith.constant 0 : i32
    return %c0_i32, %c0_i32_0 : i32, i32
  }
  func.func @transform_2(%arg0: i32) -> (i32, i32) {
    %c0_i32 = arith.constant 0 : i32
    %c0_i32_0 = arith.constant 0 : i32
    %c0_i32_1 = arith.constant 0 : i32
    return %c0_i32, %c0_i32_0 : i32, i32
  }
  func.func @transform_3(%arg0: i32) -> (i32, i32, i32) {
    %c0_i32 = arith.constant 0 : i32
    %c0_i32_0 = arith.constant 0 : i32
    %c0_i32_1 = arith.constant 0 : i32
    return %arg0, %c0_i32, %c0_i32_0 : i32, i32, i32
  }
}

</mosaic_0001>

<bundles_post_ra>
// kernel: tpu_custom_call.1
= control target key start
LH: loop header
LB: loop body
LE: loop exit
PB: predicated region body
PF: predicated region fallthrough
CT: control target
= control target key end

     0   :  { %s735_s12 = smov 0   ;;  %s823_s0 = inlined_call_operand.vmem [shape: f32[2,32,16], index: 0, kind: input, shape index: {}]   ;;  %s824_s1 = inlined_call_operand.vmem [shape: f32[32,7], index: 1, kind: input, shape index: {}]   ;;  %s825_s2 = inlined_call_operand.vmem [shape: f32[10,16], index: 2, kind: input, shape index: {}]   ;;  %s826_s3 = inlined_call_operand.vmem [shape: f32[2,32,16], index: 3, kind: output, shape index: {}]  }
   0x1 LB: > { %s620_s13 = sadd.s32 4294967295, %s700_s12   ;;  %p624_p0 = scmp.ge.s32.totalorder %s700_s12, 1  ;;  %s700_s12 = sphi %s735_s12, %s13_s12  }
   0x2   : > { %p137_p1 = scmp.lt.s32.totalorder %s700_s12, 3 }
   0x4   : > { %p138_p2 = pnand %p624_p0, %p137_p1 }
   0x5   : > { %p161_p3 = scmp.lt.s32.totalorder (!%p138_p2), %s620_s13, 1  ;;  %s709_s26 = smov (!%p138_p2), 127  }
   0x6   : > { %141 = sbr.rel (%p138_p2) target bundleno = 509 (0x1fd), region = 32  ;;  %s710_s27 = smov (!%p138_p2), 126  }
   0x7   : > { %s711_s28 = smov (!%p138_p2), 125   ;;  %s712_s29 = smov (!%p138_p2), 124  }
   0x8   : > { %s713_s30 = smov (!%p138_p2), 123   ;;  %s714_s8 = smov (!%p138_p2), 122  }
   0xb   : > { %v190_v0 = vld [vmem:[%s824_s1 + $0x8] sm:$0xff]  ;;  %v189_v1 = vld [vmem:[%s824_s1] sm:$0xff]  ;;  %v702_v2 = vmov 1   ;;  %v192_v3 = vld [vmem:[%s824_s1 + $0x18] sm:$0xff]  ;;  %v703_v5 = vmov 2   ;;  %v704_v6 = vmov 3  }
   0xc   : > { %680 = vset.pattern.permute.xlu1 %v702_v2  ;;  %679 = vset.pattern.permute.xlu0 %v702_v2  ;;  %v191_v4 = vld [vmem:[%s824_s1 + $0x10] sm:$0xff]  ;;  %v705_v7 = vmov 4   ;;  %v706_v8 = vmov 5   ;;  %v707_v9 = vmov 6   ;;  %v708_v10 = vmov 0   ;;  %s828_s13 = smov (!%p161_p3, %s620_s13), 1 }
   0xd   : > { %222 = vperm.xlu1 %680, %v190_v0   ;;  %218 = vperm.xlu0 %679, %v189_v1   ;;  %s636_s22 = sshll.u32 %s828_s13, 5  ;;  %vm175_vm0 = vcmask 130048   ;;  %vm472_vm1 = vcmask 1041408   ;;  %vm459_vm2 = vcmask 80896  }
   0xe   : > { %s165_s25 = scalar_lea.vmem %s823_s0, %s636_s22  ;;  %s170_s11 = scalar_lea.vmem %s826_s3, %s636_s22 }
   0xf   : > { %v171_v11 = vld [vmem:[%s165_s25] sm:$0xff]  ;;  %v172_v12 = vld [vmem:[%s165_s25 + $0x8] sm:$0xff]  ;;  %v173_v15 = vld [vmem:[%s165_s25 + $0x10] sm:$0xff] }
  0x10   : > { %v176_v13 = vsel %vm175_vm0, %v171_v11, 0.0  ;;  %v177_v14 = vsel %vm175_vm0, %v172_v12, 0.0  ;;  %v179_v17 = vsel %vm175_vm0, %v173_v15, 0.0  ;;  %v174_v18 = vld [vmem:[%s165_s25 + $0x18] sm:$0xff] }
  0x11   : > { %230 = vperm.xlu1 %680, %v192_v3   ;;  %226 = vperm.xlu0 %679, %v191_v4   ;;  %v178_v16 = vadd.f32 %v177_v14, %v176_v13  ;;  %v181_v20 = vsel %vm175_vm0, %v174_v18, 0.0 }
  0x13   : > { %v180_v19 = vadd.f32 %v179_v17, %v178_v16 }
  0x15   : > { %682 = vset.pattern.permute.xlu1 %v703_v5  ;;  %681 = vset.pattern.permute.xlu0 %v703_v5  ;;  %v182_v21 = vadd.f32 %v181_v20, %v180_v19 }
  0x16   : > { %266 = vperm.xlu1 %682, %v191_v4   ;;  %258 = vperm.xlu0 %681, %v189_v1  }
  0x17   : > { %v183_v22 = vrot.slane %v182_v21, 4 }
  0x19   : > { %v184_v23 = vadd.f32 %v183_v22, %v182_v21 }
  0x1a   : > { %262 = vperm.xlu1 %682, %v190_v0   ;;  %270 = vperm.xlu0 %681, %v192_v3  }
  0x1b   : > { %v185_v24 = vrot.slane %v184_v23, 2 }
  0x1d   : > { %v186_v25 = vadd.f32 %v185_v24, %v184_v23 }
  0x1e   : > { %683 = vset.pattern.permute.xlu1 %v704_v6  ;;  %684 = vset.pattern.permute.xlu0 %v704_v6 }
  0x1f   : > { %298 = vperm.xlu1 %683, %v189_v1   ;;  %306 = vperm.xlu0 %684, %v191_v4   ;;  %v187_v26 = vrot.slane %v186_v25, 1 }
  0x21   : > { %v771_v27 = vadd.f32 %v187_v26, %v186_v25 }
  0x23   : > { %302 = vperm.xlu1 %683, %v190_v0   ;;  %685 = vset.pattern.permute.xlu0 %v705_v7 }
  0x24   : > { %338 = vperm.xlu0 %685, %v189_v1  }
  0x27   : > { %310 = vperm.xlu1 %683, %v192_v3  }
  0x28   : > { %350 = vperm.xlu0 %685, %v192_v3  }
  0x2b   : > { %686 = vset.pattern.permute.xlu1 %v705_v7 }
  0x2c   : > { %346 = vperm.xlu1 %686, %v191_v4   ;;  %688 = vset.pattern.permute.xlu0 %v706_v8 }
  0x2d   : > { %386 = vperm.xlu0 %688, %v191_v4  }
  0x30   : > { %342 = vperm.xlu1 %686, %v190_v0  }
  0x31   : > { %689 = vset.pattern.permute.xlu0 %v707_v9 }
  0x32   : > { %418 = vperm.xlu0 %689, %v189_v1  }
  0x34   : > { %687 = vset.pattern.permute.xlu1 %v706_v8 }
  0x35   : > { %378 = vperm.xlu1 %687, %v189_v1  }
  0x36   : > { %430 = vperm.xlu0 %689, %v192_v3  }
  0x39   : > { %382 = vperm.xlu1 %687, %v190_v0  }
  0x3a   : > { %692 = vset.pattern.permute.xlu0 %v708_v10 }
  0x3b   : > { %205 = vperm.xlu0 %692, %v191_v4  }
  0x3d   : > { %390 = vperm.xlu1 %687, %v192_v3  }
  0x3f   : > { %693 = vset.pattern.permute.xlu0 %v707_v9 }
  0x41   : > { %690 = vset.pattern.permute.xlu1 %v707_v9 }
  0x42   : > { %426 = vperm.xlu1 %690, %v191_v4   ;;  %v457_v4 = vld [vmem:[%s825_s2] sm:$0xff] }
  0x46   : > { %422 = vperm.xlu1 %690, %v190_v0  }
  0x4a   : > { %691 = vset.pattern.permute.xlu1 %v708_v10 }
  0x4b   : > { %195 = vperm.xlu1 %691, %v189_v1  }
  0x4f   : > { %200 = vperm.xlu1 %691, %v190_v0   ;;  %v458_v0 = vld [vmem:[%s825_s2 + $0x8] sm:$0x3] }
  0x50   : > { %644 = vmatprep.subr.msk.mxu0 %vm472_vm1, %v458_v0  ;;  %654 = vmatprep.subr.msk.mxu1 %vm472_vm1, %v458_v0 }
  0x51   : > { %645 = vmatpush3.msk.msra.mxu0 %vm472_vm1, %v458_v0  ;;  %656 = vmatpush3.msk.msra.mxu1 %vm472_vm1, %v458_v0 }
  0x52   : > { %646 = vmatprep.subr.mxu0 %v457_v4  ;;  %655 = vmatprep.subr.mxu1 %v457_v4 }
  0x53   : > { %210 = vperm.xlu1 %691, %v192_v3   ;;  %647 = vmatpush3.msra.mxu0 %v457_v4 }
  0x54   : > { %657 = vmatpush3.msra.mxu1 %v457_v4 }
  0x88   : > { %v223_v28 = vpop.permute.xlu1 %222  ;;  %v219_v29 = vpop.permute.xlu0 %218 }
  0x89   : > { %v233_v30 = vmul.f32 %v219_v29, %v771_v27  ;;  %v234_v33 = vmul.f32 %v223_v28, %v771_v27 }
  0x8b   : > { %241 = vrot.lane.b32.xlu0 %v233_v30, %s709_s26 }
  0x8c   : > { %v231_v31 = vpop.permute.xlu1 %230  ;;  %v227_v32 = vpop.permute.xlu0 %226 }
  0x8d   : > { %v235_v34 = vmul.f32 %v227_v32, %v771_v27  ;;  %v236_v35 = vmul.f32 %v231_v31, %v771_v27 }
  0x8f   : > { %245 = vrot.lane.b32.xlu1 %v235_v34, %s709_s26  ;;  %243 = vrot.lane.b32.xlu0 %v234_v33, %s709_s26 }
  0x91   : > { %v267_v36 = vpop.permute.xlu1 %266  ;;  %v259_v37 = vpop.permute.xlu0 %258 }
  0x92   : > { %v273_v38 = vmul.f32 %v259_v37, %v771_v27  ;;  %v275_v39 = vmul.f32 %v267_v36, %v771_v27 }
  0x93   : > { %247 = vrot.lane.b32.xlu1 %v236_v35, %s709_s26 }
  0x94   : > { %281 = vrot.lane.b32.xlu0 %v273_v38, %s710_s27 }
  0x95   : > { %v263_v40 = vpop.permute.xlu1 %262  ;;  %v271_v41 = vpop.permute.xlu0 %270 }
  0x96   : > { %v274_v42 = vmul.f32 %v263_v40, %v771_v27  ;;  %v276_v43 = vmul.f32 %v271_v41, %v771_v27 }
  0x97   : > { %285 = vrot.lane.b32.xlu1 %v275_v39, %s710_s27 }
  0x98   : > { %283 = vrot.lane.b32.xlu0 %v274_v42, %s710_s27 }
  0x9a   : > { %v299_v44 = vpop.permute.xlu1 %298  ;;  %v307_v45 = vpop.permute.xlu0 %306 }
  0x9b   : > { %v313_v46 = vmul.f32 %v299_v44, %v771_v27  ;;  %287 = vrot.lane.b32.xlu1 %v276_v43, %s710_s27  ;;  %v315_v47 = vmul.f32 %v307_v45, %v771_v27 }
  0x9d   : > { %321 = vrot.lane.b32.xlu0 %v313_v46, %s711_s28 }
  0x9e   : > { %v303_v48 = vpop.permute.xlu1 %302 }
  0x9f   : > { %v314_v49 = vmul.f32 %v303_v48, %v771_v27  ;;  %325 = vrot.lane.b32.xlu1 %v315_v47, %s711_s28  ;;  %v339_v50 = vpop.permute.xlu0 %338 }
  0xa0   : > { %v353_v51 = vmul.f32 %v339_v50, %v771_v27 }
  0xa1   : > { %323 = vrot.lane.b32.xlu0 %v314_v49, %s711_s28 }
  0xa2   : > { %v311_v52 = vpop.permute.xlu1 %310 }
  0xa3   : > { %v316_v53 = vmul.f32 %v311_v52, %v771_v27  ;;  %v351_v54 = vpop.permute.xlu0 %350 }
  0xa4   : > { %v356_v57 = vmul.f32 %v351_v54, %v771_v27 }
  0xa5   : > { %327 = vrot.lane.b32.xlu1 %v316_v53, %s711_s28  ;;  %361 = vrot.lane.b32.xlu0 %v353_v51, %s712_s29 }
  0xa7   : > { %v347_v55 = vpop.permute.xlu1 %346 }
  0xa8   : > { %v355_v56 = vmul.f32 %v347_v55, %v771_v27  ;;  %v387_v59 = vpop.permute.xlu0 %386 }
  0xa9   : > { %v395_v61 = vmul.f32 %v387_v59, %v771_v27 }
  0xaa   : > { %365 = vrot.lane.b32.xlu1 %v355_v56, %s712_s29 }
  0xab   : > { %v343_v58 = vpop.permute.xlu1 %342 }
  0xac   : > { %v354_v60 = vmul.f32 %v343_v58, %v771_v27 }
  0xad   : > { %v419_v2 = vpop.permute.xlu0 %418 }
  0xae   : > { %367 = vrot.lane.b32.xlu1 %v356_v57, %s712_s29  ;;  %363 = vrot.lane.b32.xlu0 %v354_v60, %s712_s29  ;;  %v433_v5 = vmul.f32 %v419_v2, %v771_v27 }
  0xb0   : > { %v379_v62 = vpop.permute.xlu1 %378 }
  0xb1   : > { %v393_v63 = vmul.f32 %v379_v62, %v771_v27  ;;  %v431_v10 = vpop.permute.xlu0 %430 }
  0xb2   : > { %405 = vrot.lane.b32.xlu1 %v395_v61, %s713_s30  ;;  %v436_v12 = vmul.f32 %v431_v10, %v771_v27 }
  0xb3   : > { %401 = vrot.lane.b32.xlu0 %v393_v63, %s713_s30 }
  0xb4   : > { %v383_v1 = vpop.permute.xlu1 %382 }
  0xb5   : > { %v394_v3 = vmul.f32 %v383_v1, %v771_v27 }
  0xb6   : > { %v206_v16 = vpop.permute.xlu0 %205 }
  0xb7   : > { %403 = vrot.lane.b32.xlu0 %v394_v3, %s713_s30  ;;  %v215_v35 = vmul.f32 %v206_v16, %v771_v27 }
  0xb8   : > { %v391_v6 = vpop.permute.xlu1 %390 }
  0xb9   : > { %v396_v7 = vmul.f32 %v391_v6, %v771_v27 }
  0xbb   : > { %407 = vrot.lane.b32.xlu1 %v396_v7, %s713_s30  ;;  %441 = vrot.lane.b32.xlu0 %v433_v5, %s714_s8 }
  0xbd   : > { %v427_v8 = vpop.permute.xlu1 %426 }
  0xbe   : > { %v435_v9 = vmul.f32 %v427_v8, %v771_v27 }
  0xc0   : > { %445 = vrot.lane.b32.xlu1 %v435_v9, %s714_s8 }
  0xc1   : > { %v423_v11 = vpop.permute.xlu1 %422 }
  0xc2   : > { %v434_v13 = vmul.f32 %v423_v11, %v771_v27 }
  0xc4   : > { %447 = vrot.lane.b32.xlu1 %v436_v12, %s714_s8  ;;  %443 = vrot.lane.b32.xlu0 %v434_v13, %s714_s8 }
  0xc6   : > { %v196_v14 = vpop.permute.xlu1 %195 }
  0xc7   : > { %v213_v33 = vmul.f32 %v196_v14, %v771_v27 }
  0xca   : > { %v201_v15 = vpop.permute.xlu1 %200 }
  0xcb   : > { %v214_v42 = vmul.f32 %v201_v15, %v771_v27 }
  0xce   : > { %v211_v17 = vpop.permute.xlu1 %210 }
  0xcf   : > { %v216_v46 = vmul.f32 %v211_v17, %v771_v27 }
  0xfd   : > { %v242_v18 = vpop.permute.xlu0 %241 }
  0xfe   : > { %v253_v37 = vadd.f32 %v242_v18, %v213_v33 }
 0x101   : > { %v246_v19 = vpop.permute.xlu1 %245  ;;  %v244_v20 = vpop.permute.xlu0 %243 }
 0x102   : > { %v255_v40 = vadd.f32 %v246_v19, %v215_v35  ;;  %v254_v49 = vadd.f32 %v244_v20, %v214_v42 }
 0x105   : > { %v248_v21 = vpop.permute.xlu1 %247 }
 0x106   : > { %v282_v22 = vpop.permute.xlu0 %281  ;;  %v256_v50 = vadd.f32 %v248_v21, %v216_v46 }
 0x107   : > { %v293_v39 = vadd.f32 %v282_v22, %v253_v37 }
 0x109   : > { %v286_v23 = vpop.permute.xlu1 %285 }
 0x10a   : > { %v284_v24 = vpop.permute.xlu0 %283  ;;  %v295_v47 = vadd.f32 %v286_v23, %v255_v40 }
 0x10b   : > { %v294_v55 = vadd.f32 %v284_v24, %v254_v49 }
 0x10d   : > { %v288_v25 = vpop.permute.xlu1 %287 }
 0x10e   : > { %v296_v56 = vadd.f32 %v288_v25, %v256_v50 }
 0x10f   : > { %v322_v26 = vpop.permute.xlu0 %321 }
 0x110   : > { %v333_v41 = vadd.f32 %v322_v26, %v293_v39 }
 0x111   : > { %v326_v28 = vpop.permute.xlu1 %325 }
 0x112   : > { %v335_v51 = vadd.f32 %v326_v28, %v295_v47 }
 0x113   : > { %v324_v29 = vpop.permute.xlu0 %323 }
 0x114   : > { %v334_v58 = vadd.f32 %v324_v29, %v294_v55 }
 0x117   : > { %v328_v30 = vpop.permute.xlu1 %327  ;;  %v362_v31 = vpop.permute.xlu0 %361 }
 0x118   : > { %v373_v45 = vadd.f32 %v362_v31, %v333_v41  ;;  %v336_v59 = vadd.f32 %v328_v30, %v296_v56 }
 0x11c   : > { %v366_v32 = vpop.permute.xlu1 %365 }
 0x11d   : > { %v375_v57 = vadd.f32 %v366_v32, %v335_v51 }
 0x120   : > { %v364_v34 = vpop.permute.xlu0 %363  ;;  %v368_v36 = vpop.permute.xlu1 %367 }
 0x121   : > { %v376_v27 = vadd.f32 %v368_v36, %v336_v59  ;;  %v374_v62 = vadd.f32 %v364_v34, %v334_v58 }
 0x124   : > { %v406_v43 = vpop.permute.xlu1 %405 }
 0x125   : > { %v402_v38 = vpop.permute.xlu0 %401  ;;  %v415_v60 = vadd.f32 %v406_v43, %v375_v57 }
 0x126   : > { %v413_v48 = vadd.f32 %v402_v38, %v373_v45 }
 0x129   : > { %v404_v44 = vpop.permute.xlu0 %403 }
 0x12a   : > { %v414_v0 = vadd.f32 %v404_v44, %v374_v62 }
 0x12d   : > { %v408_v52 = vpop.permute.xlu1 %407  ;;  %v442_v53 = vpop.permute.xlu0 %441 }
 0x12e   : > { %v453_v54 = vadd.f32 %v442_v53, %v413_v48  ;;  %v416_v1 = vadd.f32 %v408_v52, %v376_v27 }
 0x130   : > { %648 = vmatprep.mubr.msk.f32.mxu0 %vm459_vm2, %v453_v54 }
 0x132   : > { %v446_v61 = vpop.permute.xlu1 %445 }
 0x133   : > { %v455_v63 = vadd.f32 %v446_v61, %v415_v60 }
 0x135   : > { %651 = vmatprep.mubr.msk.f32.mxu1 %vm459_vm2, %v455_v63 }
 0x136   : > { %v448_v2 = vpop.permute.xlu1 %447  ;;  %v444_v3 = vpop.permute.xlu0 %443 }
 0x137   : > { %v456_v4 = vadd.f32 %v448_v2, %v416_v1  ;;  %v454_v5 = vadd.f32 %v444_v3, %v414_v0 }
 0x139   : > { %649 = vmatmul.mubr.msk.f32.vlgmr.msra.gmra.mxu0 %vm459_vm2, %v454_v5  ;;  %652 = vmatmul.mubr.msk.f32.vlgmr.msra.gmra.mxu1 %vm459_vm2, %v456_v4 }
 0x1f9   : > { %v650_v6 = vpop.f32.mrf.mxu0  ;;  %v653_v7 = vpop.f32.mrf.mxu1 }
 0x1fa   : > { %562 = vst.msk [vmem:[%s170_s11 + $0x8] sm:$0xff] %vm175_vm0, %v650_v6  ;;  %564 = vst.msk [vmem:[%s170_s11 + $0x18] sm:$0xff] %vm175_vm0, %v653_v7 }
 0x1fb   : > { %v542_v8 = vpop.f32.mrf.mxu0  ;;  %v552_v9 = vpop.f32.mrf.mxu1 }
 0x1fc   : > { %561 = vst.msk [vmem:[%s170_s11] sm:$0xff] %vm175_vm0, %v542_v8  ;;  %563 = vst.msk [vmem:[%s170_s11 + $0x10] sm:$0xff] %vm175_vm0, %v552_v9 }
 0x1fd PF: > { %s13_s12 = sadd.s32 1, %s700_s12  }
 0x1fe   : > { %p10_p4 = scmp.ge.s32.totalorder %s13_s12, 4  }
 0x200   :  { %12 = sbr.rel (!%p10_p4) target bundleno = 1 (0x1), region = 62 }

</bundles_post_ra>
